<compile_context>
chip_gen: v7x
topology: tpu7x:2x2x1
jax: 0.10.0
libtpu: 0.0.40
codegen_flags: <defaults>
</compile_context>

<pallas_src>
import functools
import math

import jax
import jax.numpy as jnp
from jax.experimental import pallas as pl
from jax.experimental.pallas import tpu as pltpu

_NEG_INF = -1e30  # large-negative instead of -inf: keeps online softmax NaN-free


def _round_up(n, m):
    return (n + m - 1) // m * m


# ---------------------------------------------------------------------------
# Bias-free linear layer: (M, K) @ (K, N) -> (M, N)
# ---------------------------------------------------------------------------
def _linear_kernel(x_ref, w_ref, o_ref):
    o_ref[...] = jnp.dot(
        x_ref[...], w_ref[...], preferred_element_type=jnp.float32
    ).astype(o_ref.dtype)


def linear_nobias(x2, w, *, max_tm=256, max_tn=512):
    """x2: (M, K); w: (K, N) (pre-transposed PyTorch weight). Returns (M, N)."""
    M, K = x2.shape
    Kw, N = w.shape
    assert K == Kw

    # Row tile: as large as possible (feeds the MXU M dimension), multiple of 8.
    tm = min(max_tm, _round_up(M, 8))
    Mp = _round_up(M, tm)
    # Column tile: full N when small; 256-wide lane-dense tiles when large so
    # the weight streams in bounded VMEM chunks instead of sitting resident.
    # TODO(synk): for very large K (n_embd), add a K grid axis + f32 accumulator.
    if N <= max_tn:
        tn, Np = N, N
    else:
        tn = 256
        Np = _round_up(N, tn)

    xp = jnp.pad(x2, ((0, Mp - M), (0, 0))) if Mp != M else x2
    wp = jnp.pad(w, ((0, 0), (0, Np - N))) if Np != N else w

    out = pl.pallas_call(
        _linear_kernel,
        out_shape=jax.ShapeDtypeStruct((Mp, Np), x2.dtype),
        grid_spec=pltpu.PrefetchScalarGridSpec(
            num_scalar_prefetch=0,
            grid=(Mp // tm, Np // tn),
            in_specs=[
                pl.BlockSpec((tm, K), lambda i, j: (i, 0)),   # activation row tile
                pl.BlockSpec((K, tn), lambda i, j: (0, j)),   # weight column tile
            ],
            out_specs=pl.BlockSpec((tm, tn), lambda i, j: (i, j)),
        ),
        compiler_params=pltpu.CompilerParams(
            dimension_semantics=("parallel", "parallel")),
    )(xp, wp)

    if Mp != M or Np != N:
        out = out[:M, :N]
    return out


# ---------------------------------------------------------------------------
# Causal flash attention: q, k, v of shape (B*H, S, head_dim)
# ---------------------------------------------------------------------------
def _attn_kernel(q_ref, k_ref, v_ref, o_ref, m_sc, l_sc, acc_sc, *, scale, tq, tk):
    qi = pl.program_id(1)
    ki = pl.program_id(2)

    @pl.when(ki == 0)
    def _init():
        m_sc[...] = jnp.full_like(m_sc, _NEG_INF)
        l_sc[...] = jnp.zeros_like(l_sc)
        acc_sc[...] = jnp.zeros_like(acc_sc)

    # Skip kv blocks that lie entirely above the causal diagonal.
    @pl.when(ki * tk <= qi * tq + (tq - 1))
    def _compute():
        s = jnp.einsum(
            "bqd,bkd->bqk", q_ref[...], k_ref[...],
            preferred_element_type=jnp.float32) * scale
        row = qi * tq + jax.lax.broadcasted_iota(jnp.int32, (1, tq, tk), 1)
        col = ki * tk + jax.lax.broadcasted_iota(jnp.int32, (1, tq, tk), 2)
        s = jnp.where(col <= row, s, _NEG_INF)

        m_prev = m_sc[...]
        m_new = jnp.maximum(m_prev, s.max(axis=-1, keepdims=True))
        alpha = jnp.exp(m_prev - m_new)
        p = jnp.exp(s - m_new)
        # TODO(synk): attention-dropout omitted (identity in eval mode);
        # training would mask `p` with pltpu.prng_seed / prng_random_bits.
        l_sc[...] = alpha * l_sc[...] + p.sum(axis=-1, keepdims=True)
        acc_sc[...] = alpha * acc_sc[...] + jnp.einsum(
            "bqk,bkd->bqd", p.astype(v_ref.dtype), v_ref[...],
            preferred_element_type=jnp.float32)
        m_sc[...] = m_new

    @pl.when(ki == pl.num_programs(2) - 1)
    def _finalize():
        o_ref[...] = (acc_sc[...] / l_sc[...]).astype(o_ref.dtype)


def causal_flash_attention(q, k, v, *, scale, max_tile=128):
    """q, k, v: (BH, S, hd). Returns (BH, S, hd) of causal attention output."""
    BH, S, hd = q.shape
    tq = min(max_tile, _round_up(S, 8))
    tk = tq
    Sp = _round_up(S, tq)
    if Sp != S:
        pad = ((0, 0), (0, Sp - S), (0, 0))
        q, k, v = jnp.pad(q, pad), jnp.pad(k, pad), jnp.pad(v, pad)
    nq, nkv = Sp // tq, Sp // tk

    kernel = functools.partial(_attn_kernel, scale=scale, tq=tq, tk=tk)
    out = pl.pallas_call(
        kernel,
        out_shape=jax.ShapeDtypeStruct((BH, Sp, hd), q.dtype),
        grid_spec=pltpu.PrefetchScalarGridSpec(
            num_scalar_prefetch=0,
            grid=(BH, nq, nkv),
            in_specs=[
                pl.BlockSpec((1, tq, hd), lambda bh, qi, ki: (bh, qi, 0)),  # Q
                pl.BlockSpec((1, tk, hd), lambda bh, qi, ki: (bh, ki, 0)),  # K
                pl.BlockSpec((1, tk, hd), lambda bh, qi, ki: (bh, ki, 0)),  # V
            ],
            out_specs=pl.BlockSpec((1, tq, hd), lambda bh, qi, ki: (bh, qi, 0)),
            scratch_shapes=[
                pltpu.VMEM((1, tq, 1), jnp.float32),    # running max m
                pltpu.VMEM((1, tq, 1), jnp.float32),    # running denom l
                pltpu.VMEM((1, tq, hd), jnp.float32),   # output accumulator
            ],
        ),
        compiler_params=pltpu.CompilerParams(
            dimension_semantics=("parallel", "parallel", "arbitrary")),
    )(q, k, v)

    return out[:, :S, :] if Sp != S else out


# ---------------------------------------------------------------------------
# Full module forward
# ---------------------------------------------------------------------------
def multi_head_attention(x, w_qkv, w_proj, *, n_head):
    """x: (B, S, D); w_qkv: (D, 3D); w_proj: (D, D)  (weights pre-transposed
    to (in, out) relative to PyTorch's nn.Linear layout)."""
    B, S, D = x.shape
    assert D % n_head == 0
    hd = D // n_head
    M = B * S

    # QKV projection.
    qkv = linear_nobias(x.reshape(M, D), w_qkv).reshape(B, S, 3, n_head, hd)
    q = qkv[:, :, 0].transpose(0, 2, 1, 3).reshape(B * n_head, S, hd)
    k = qkv[:, :, 1].transpose(0, 2, 1, 3).reshape(B * n_head, S, hd)
    v = qkv[:, :, 2].transpose(0, 2, 1, 3).reshape(B * n_head, S, hd)

    # Causal scaled-dot-product attention.
    o = causal_flash_attention(q, k, v, scale=1.0 / math.sqrt(hd))

    # Merge heads + output projection.  Output dropout is identity (eval mode).
    y = o.reshape(B, n_head, S, hd).transpose(0, 2, 1, 3).reshape(M, D)
    return linear_nobias(y, w_proj).reshape(B, S, D)


# ---------------------------------------------------------------------------
# Reference (pure JAX, mirrors the PyTorch forward) and test
# ---------------------------------------------------------------------------
def _reference_mha(x, w_qkv, w_proj, n_head):
    B, S, D = x.shape
    hd = D // n_head
    hi = jax.lax.Precision.HIGHEST
    qkv = jnp.einsum("bsd,df->bsf", x, w_qkv, precision=hi)
    q, k, v = jnp.split(qkv, 3, axis=-1)

    def heads(t):
        return t.reshape(B, S, n_head, hd).transpose(0, 2, 1, 3)

    q, k, v = heads(q), heads(k), heads(v)
    att = jnp.einsum("bhqd,bhkd->bhqk", q, k, precision=hi) / math.sqrt(hd)
    mask = jnp.tril(jnp.ones((S, S), dtype=bool))
    att = jnp.where(mask[None, None], att, -jnp.inf)
    att = jax.nn.softmax(att, axis=-1)
    y = jnp.einsum("bhqk,bhkd->bhqd", att, v, precision=hi)
    y = y.transpose(0, 2, 1, 3).reshape(B, S, D)
    return jnp.einsum("bsd,de->bse", y, w_proj, precision=hi)


if __name__ == "__main__":
    # Small config: batch=2, seq=8, n_embd=32, n_head=4 -> head_dim=8
    B, S, D, n_head = 2, 8, 32, 4

    key = jax.random.PRNGKey(0)
    kx, k1, k2 = jax.random.split(key, 3)

    x = jax.random.normal(kx, (B, S, D), dtype=jnp.float32)
    # PyTorch nn.Linear init: U(-1/sqrt(in), 1/sqrt(in)); stored as (in, out).
    bound = 1.0 / math.sqrt(D)
    w_qkv = jax.random.uniform(k1, (D, 3 * D), minval=-bound, maxval=bound,
                               dtype=jnp.float32)
    w_proj = jax.random.uniform(k2, (D, D), minval=-bound, maxval=bound,
                                dtype=jnp.float32)

    y = jax.block_until_ready(multi_head_attention(x, w_qkv, w_proj, n_head=n_head))

    y_ref = _reference_mha(x, w_qkv, w_proj, n_head)
    assert y.shape == (B, S, D)
    err = float(jnp.max(jnp.abs(y - y_ref)))
    assert jnp.allclose(y, y_ref, atol=1e-3, rtol=1e-3), f"max abs err = {err}"
    print("KERNEL_OK")
</pallas_src>

<mosaic_0001>
module attributes {stable_mosaic.version = 11 : i64} {
  func.func @_linear_kernel(%arg0: i32, %arg1: i32, %arg2: memref<16x32xf32, #tpu.memory_space<vmem>>, %arg3: memref<32x96xf32, #tpu.memory_space<vmem>>, %arg4: memref<16x96xf32, #tpu.memory_space<vmem>>) attributes {dimension_semantics = [#tpu.dimension_semantics<parallel>, #tpu.dimension_semantics<parallel>], iteration_bounds = array<i64: 1, 1>, scalar_prefetch = 0 : i64, scratch_operands = 0 : i64, tpu.core_type = #tpu.core_type<tc>, window_params = [{transform_indices = @transform_0, window_bounds = array<i64: 16, 32>}, {transform_indices = @transform_1, window_bounds = array<i64: 32, 96>}, {transform_indices = @transform_2, window_bounds = array<i64: 16, 96>}]} {
    %c0 = arith.constant 0 : index
    %c0_0 = arith.constant 0 : index
    %0 = vector.load %arg2[%c0, %c0_0] : memref<16x32xf32, #tpu.memory_space<vmem>>, vector<16x32xf32>
    %c0_1 = arith.constant 0 : index
    %c0_2 = arith.constant 0 : index
    %1 = vector.load %arg3[%c0_1, %c0_2] : memref<32x96xf32, #tpu.memory_space<vmem>>, vector<32x96xf32>
    %cst = arith.constant dense<0.000000e+00> : vector<16x96xf32>
    %2 = tpu.matmul %0, %1, %cst {dimension_numbers = #tpu.dot_dimension_numbers<[1], [0], [0], [1], [0, 0, 1, 1], [], []>} : vector<16x32xf32>, vector<32x96xf32>, vector<16x96xf32> -> vector<16x96xf32>
    %c0_3 = arith.constant 0 : index
    %c0_4 = arith.constant 0 : index
    %3 = vector.load %arg4[%c0_3, %c0_4] : memref<16x96xf32, #tpu.memory_space<vmem>>, vector<16x96xf32>
    tpu.vector_store %arg4[%c0_3, %c0_4], %2 {strides = array<i32>} : memref<16x96xf32, #tpu.memory_space<vmem>>, vector<16x96xf32>,
    return
  }
  func.func @transform_0(%arg0: i32, %arg1: i32) -> (i32, i32) {
    %c0_i32 = arith.constant 0 : i32
    %c0_i32_0 = arith.constant 0 : i32
    return %arg0, %c0_i32 : i32, i32
  }
  func.func @transform_1(%arg0: i32, %arg1: i32) -> (i32, i32) {
    %c0_i32 = arith.constant 0 : i32
    %c0_i32_0 = arith.constant 0 : i32
    return %c0_i32, %arg1 : i32, i32
  }
  func.func @transform_2(%arg0: i32, %arg1: i32) -> (i32, i32) {
    %c0_i32 = arith.constant 0 : i32
    return %arg0, %arg1 : i32, i32
  }
}

</mosaic_0001>

<bundles_post_ra>
// kernel: tpu_custom_call.1
= control target key start
LH: loop header
LB: loop body
LE: loop exit
PB: predicated region body
PF: predicated region fallthrough
CT: control target
= control target key end

     0   :  { %7 = vsyncpa [#allocation3], 0  ;;  %s318_s0 = inlined_call_operand.hbm [shape: f32[16,32], index: 0, kind: input, shape index: {}]   ;;  %s319_s1 = inlined_call_operand.hbm [shape: f32[32,96], index: 1, kind: input, shape index: {}]   ;;  %s320_s2 = inlined_call_operand.hbm [shape: f32[16,96], index: 2, kind: output, shape index: {}]  }
   0x1   :  { %8 = vsyncpa [#allocation6], 0 }
   0x2   :  { %9 = vsyncpa [#allocation4], 0  ;;  %s253_s9 = smov [#allocation2]   ;;  %s181_s13 = scalar_lea.hbm %s318_s0, 256 }
   0x3   :  { %s15_s10 = sshll.u32 %s253_s9, 4  ;;  %p182_p0 = scmp.ne.s32.totalorder %s318_s0, %s181_s13  ;;  %s16_s10 = int_to_ptr.vmem [resolvable:$true] %s15_s10 }
   0x4   :  { %p185_p1 = scmp.lt.u32.totalorder %s181_s13, %s318_s0 }
   0x6   :  { %p187_p2 = pnand %p185_p1, %p182_p0 }
   0x8   :  { %190 = shalt.err (!%p187_p2)
}
   0x9   :  { %s191_s18 = scalar_lea.vmem %s16_s10, 256  ;;  %p196_p4 = scmp.lt.s32.totalorder %s16_s10, %s16_s10 }
   0xa   :  { %p192_p3 = scmp.ne.s32.totalorder %s16_s10, %s191_s18  ;;  %p197_p5 = scmp.lt.s32.totalorder %s191_s18, %s191_s18 }
   0xc   :  { %p198_p6 = por %p197_p5, %p196_p4 }
   0xe   :  { %p199_p7 = pnand %p198_p6, %p192_p3 }
  0x10   :  { %202 = shalt.err (!%p199_p7)
}
  0x11   :  { %s254_s19 = smov 128   ;;  %s255_s20 = smov 8  }
  0x12   :  { %21 = dma.hbm_to_vmem [thread:$0]  %s318_s0, 256, %s16_s10, [#allocation3], %s254_s19, %s254_s19, %s255_s20  }
  0x13   :  { %s256_s23 = smov [#allocation5]   ;;  %s203_s27 = scalar_lea.hbm %s319_s1, 512 }
  0x14   :  { %s27_s24 = sshll.u32 %s256_s23, 4  ;;  %p204_p8 = scmp.ne.s32.totalorder %s319_s1, %s203_s27  ;;  %s28_s24 = int_to_ptr.vmem [resolvable:$true] %s27_s24 }
  0x15   :  { %p207_p9 = scmp.lt.u32.totalorder %s203_s27, %s319_s1 }
  0x17   :  { %p209_p10 = pnand %p207_p9, %p204_p8 }
  0x19   :  { %212 = shalt.err (!%p209_p10)
}
  0x1a   :  { %s213_s4 = scalar_lea.vmem %s28_s24, 512  ;;  %p218_p12 = scmp.lt.s32.totalorder %s28_s24, %s28_s24 }
  0x1b   :  { %p214_p11 = scmp.ne.s32.totalorder %s28_s24, %s213_s4  ;;  %p219_p13 = scmp.lt.s32.totalorder %s213_s4, %s213_s4 }
  0x1d   :  { %p220_p0 = por %p219_p13, %p218_p12 }
  0x1f   :  { %p221_p1 = pnand %p220_p0, %p214_p11 }
  0x21   :  { %224 = shalt.err (!%p221_p1)
}
  0x22   :  { %33 = dma.hbm_to_vmem [thread:$0]  %s319_s1, 512, %s28_s24, [#allocation6], %s254_s19, %s254_s19, %s255_s20  }
  0x23   :  { %247 = dma.done.wait [#allocation3], 256  }
  0x24   :  { %248 = vsyncadd [#allocation3], 4294967040 }
  0x25   :  { %249 = dma.done.wait [#allocation6], 512  }
  0x26   :  { %250 = vsyncadd [#allocation6], 4294966784  ;;  %vm46_vm0 = vcmask 261120   ;;  %v42_v0 = vld [vmem:[#allocation5] sm:$0xff]  ;;  %v43_v1 = vld [vmem:[#allocation5 + $0x8] sm:$0xff]  ;;  %s257_s1 = smov [#allocation7]  }
  0x27   :  { %v44_v2 = vld [vmem:[#allocation5 + $0x10] sm:$0xff]  ;;  %v168_v3 = vpack.c.bf16 %v43_v1, %v42_v0  ;;  %v45_v4 = vld [vmem:[#allocation5 + $0x18] sm:$0xff]  ;;  %s136_s6 = sshll.u32 %s257_s1, 4  ;;  %vm128_vm1 = vcmask 785408   ;;  %s137_s6 = int_to_ptr.vmem [resolvable:$true] %s136_s6 }
  0x28   :  { %v40_v5 = vld [vmem:[#allocation2] sm:$0xff]  ;;  %v172_v6 = vpack.c.bf16 %v45_v4, %v44_v2  ;;  %v41_v7 = vld [vmem:[#allocation2 + $0x8] sm:$0xff]  ;;  %s225_s7 = scalar_lea.vmem %s137_s6, 256  ;;  %p230_p3 = scmp.lt.s32.totalorder %s137_s6, %s137_s6 }
  0x29   :  { %165 = vmatprep.mubr.msk.f32.mxu0 %vm46_vm0, %v40_v5  ;;  %169 = vmatprep.subr.bf16.mxu0 %v168_v3  ;;  %p226_p2 = scmp.ne.s32.totalorder %s137_s6, %s225_s7  ;;  %p231_p4 = scmp.lt.s32.totalorder %s225_s7, %s225_s7 }
  0x2a   :  { %171 = vmatpush3.bf16.msra.mxu0 %v168_v3 }
  0x2b   :  { %173 = vmatprep.subr.bf16.mxu0 %v172_v6  ;;  %p232_p5 = por %p231_p4, %p230_p3 }
  0x2d   :  { %p233_p6 = pnand %p232_p5, %p226_p2 }
  0x2e   :  { %175 = vmatpush3.bf16.msra.mxu0 %v172_v6 }
  0x31   :  { %166 = vmatmul.mubr.msk.f32.vlgmr.msra.gmra.mrb[0].mxu0 %vm46_vm0, %v41_v7 }
 0x104   :  { %v167_v8 = vpop.f32.mrb[0].mxu0 }
 0x105   :  { %130 = vst.msk [vmem:[#allocation7 + $0x8] sm:$0xff] %vm128_vm1, %v167_v8  ;;  %v119_v9 = vpop.f32.mrb[1].mxu0 }
 0x106   :  { %129 = vst.msk [vmem:[#allocation7] sm:$0xff] %vm128_vm1, %v119_v9 }
 0x107   :  { %236 = shalt.err (!%p233_p6)
}
 0x108   :  { %s237_s10 = scalar_lea.hbm %s320_s2, 256 }
 0x109   :  { %p238_p7 = scmp.ne.s32.totalorder %s320_s2, %s237_s10  ;;  %p241_p8 = scmp.lt.u32.totalorder %s237_s10, %s320_s2 }
 0x10b   :  { %p243_p9 = pnand %p241_p8, %p238_p7 }
 0x10d   :  { %246 = shalt.err (!%p243_p9)
}
 0x10e   :  { %142 = dma.vmem_to_hbm [thread:$0]  %s137_s6, 256, %s320_s2, [#allocation4], %s254_s19, %s254_s19, %s255_s20  }
 0x10f   :  { %251 = dma.done.wait [#allocation4], 256  }
 0x110   :  { %252 = vsyncadd [#allocation4], 4294967040 }
 0x111   :  { %146 = vsyncpa [#allocation3], 1 }
 0x112   :  { %147 = vsyncpa [#allocation6], 1 }
 0x113   :  { %148 = vsyncpa [#allocation4], 1 }

</bundles_post_ra>
